<compile_context>
chip_gen: v7x
topology: tpu7x:2x2x1
jax: 0.10.0
libtpu: 0.0.40
codegen_flags: <defaults>
</compile_context>

<pallas_src>
import functools

import jax
import jax.numpy as jnp
from jax.experimental import pallas as pl
from jax.experimental.pallas import tpu as pltpu

_LANE = 128
_SUBLANE = 8

_ACTIVATIONS = {
    "relu": lambda v: jnp.maximum(v, 0.0),
    "tanh": jnp.tanh,
    "silu": lambda v: v * jax.nn.sigmoid(v),
    "sin": jnp.sin,
}


def _round_up(x, m):
    return ((x + m - 1) // m) * m


def _resmlp_kernel(x_ref, win_ref, bin_ref, wh_ref, bh_ref, wout_ref, bout_ref,
                   o_ref, *, n_hidden_layers, output_scale,
                   disable_residual_connections, activation, unroll_threshold):
    act_fn = _ACTIVATIONS[activation]
    w_dtype = win_ref.dtype

    # Input layer + activation. Weights are already [in, out]: no transpose.
    out = jnp.dot(x_ref[...], win_ref[...], preferred_element_type=jnp.float32)
    out = act_fn(out + bin_ref[...].astype(jnp.float32))

    def layer(l, h):
        w = wh_ref[l]                          # (Hp, Hp), native param dtype
        b = bh_ref[l]                          # (1, Hp)
        pre = jnp.dot(h.astype(w_dtype), w, preferred_element_type=jnp.float32)
        a = act_fn(pre + b.astype(jnp.float32))
        return a if disable_residual_connections else h + a

    if n_hidden_layers > 0:
        if n_hidden_layers <= unroll_threshold:
            for l in range(n_hidden_layers):   # static unroll for small L
                out = layer(l, out)
        else:                                   # bounded live ranges for big L
            out = jax.lax.fori_loop(0, n_hidden_layers, layer, out)

    y = jnp.dot(out.astype(w_dtype), wout_ref[...],
                preferred_element_type=jnp.float32)
    y = y + bout_ref[...].astype(jnp.float32)
    o_ref[...] = (output_scale * y).astype(o_ref.dtype)


def resmlp_forward(x, params, *, output_scale=1.0, activation="relu",
                   disable_residual_connections=False, batch_tile=256,
                   unroll_threshold=8):
    """Fused ResMLP forward. x: (N, input_dim); params in PyTorch Linear layout."""
    w_in, b_in, w_h, b_h, w_out, b_out = params
    N, input_dim = x.shape
    H = int(w_in.shape[0])
    output_dim = int(w_out.shape[0])
    L = int(w_h.shape[0])
    dtype = x.dtype

    # Lane-dense padded dims (multiples of 128).
    # TODO(synk): pad to 256 on v6e/v7x when H is large enough to benefit.
    Dp = _round_up(input_dim, _LANE)
    Hp = _round_up(H, _LANE)
    Op = _round_up(output_dim, _LANE)

    # Batch tiling: big MXU-height tiles; pad batch so the grid divides evenly.
    tb = min(_round_up(batch_tile, _SUBLANE), _round_up(N, _SUBLANE))
    Np = _round_up(N, tb)

    # Zero-pad input and pre-transpose weights to [in, out] (PyTorch stores
    # [out, in]). Zero padding keeps the extra hidden/output columns exactly
    # zero through relu/residual, so slicing the result reproduces the module.
    x_p = jnp.zeros((Np, Dp), dtype).at[:N, :input_dim].set(x)
    w_in_t = jnp.zeros((Dp, Hp), dtype).at[:input_dim, :H].set(
        w_in.T.astype(dtype))
    b_in_p = jnp.zeros((1, Hp), dtype).at[0, :H].set(b_in.astype(dtype))

    L_eff = max(L, 1)  # avoid zero-extent blocks when there are no hidden layers
    w_h_t = jnp.zeros((L_eff, Hp, Hp), dtype)
    b_h_p = jnp.zeros((L_eff, 1, Hp), dtype)
    if L > 0:
        w_h_t = w_h_t.at[:L, :H, :H].set(jnp.swapaxes(w_h, 1, 2).astype(dtype))
        b_h_p = b_h_p.at[:L, 0, :H].set(b_h.astype(dtype))

    w_out_t = jnp.zeros((Hp, Op), dtype).at[:H, :output_dim].set(
        w_out.T.astype(dtype))
    b_out_p = jnp.zeros((1, Op), dtype).at[0, :output_dim].set(
        b_out.astype(dtype))

    itemsize = jnp.dtype(dtype).itemsize
    weight_bytes = (w_in_t.size + b_in_p.size + w_h_t.size + b_h_p.size +
                    w_out_t.size + b_out_p.size) * itemsize
    act_bytes = tb * (Dp + Op) * itemsize * 2 + 4 * tb * Hp * 4
    # Constant-index weight blocks are still double-buffered by default.
    # TODO(synk): stream per-layer weights via pl.ANY + make_async_copy when
    # 2*weight_bytes exceeds ~48 MiB (v7x has only 64 MiB VMEM per TensorCore).
    vmem_limit = int(min(128 << 20,
                         max(32 << 20,
                             2 * weight_bytes + 2 * act_bytes + (8 << 20))))

    flops = 2 * Np * (Dp * Hp + L * Hp * Hp + Hp * Op)
    bytes_accessed = int(x_p.size * itemsize + weight_bytes + Np * Op * itemsize)
    cost = pl.CostEstimate(flops=flops, transcendentals=0,
                           bytes_accessed=bytes_accessed)

    kernel = functools.partial(
        _resmlp_kernel,
        n_hidden_layers=L,
        output_scale=float(output_scale),
        disable_residual_connections=bool(disable_residual_connections),
        activation=activation,
        unroll_threshold=unroll_threshold,
    )

    y_p = pl.pallas_call(
        kernel,
        out_shape=jax.ShapeDtypeStruct((Np, Op), dtype),
        grid_spec=pltpu.PrefetchScalarGridSpec(
            num_scalar_prefetch=0,
            grid=(Np // tb,),
            in_specs=[
                pl.BlockSpec((tb, Dp), lambda i: (i, 0)),        # x tile
                pl.BlockSpec((Dp, Hp), lambda i: (0, 0)),        # W_in^T
                pl.BlockSpec((1, Hp), lambda i: (0, 0)),         # b_in
                pl.BlockSpec((L_eff, Hp, Hp), lambda i: (0, 0, 0)),  # W_h^T
                pl.BlockSpec((L_eff, 1, Hp), lambda i: (0, 0, 0)),   # b_h
                pl.BlockSpec((Hp, Op), lambda i: (0, 0)),        # W_out^T
                pl.BlockSpec((1, Op), lambda i: (0, 0)),         # b_out
            ],
            out_specs=pl.BlockSpec((tb, Op), lambda i: (i, 0)),
        ),
        compiler_params=pltpu.CompilerParams(
            dimension_semantics=("parallel",),
            vmem_limit_bytes=vmem_limit,
        ),
        cost_estimate=cost,
    )(x_p, w_in_t, b_in_p, w_h_t, b_h_p, w_out_t, b_out_p)

    return y_p[:N, :output_dim]


def init_params(key, input_dim, output_dim, n_hidden_layers, n_hidden_units):
    """Deterministic synthetic init (PyTorch-Linear-shaped parameters)."""
    keys = jax.random.split(key, 6)

    def u(k, shape, fan_in):
        bound = 1.0 / jnp.sqrt(jnp.float32(fan_in))
        return jax.random.uniform(k, shape, jnp.float32, -bound, bound)

    w_in = u(keys[0], (n_hidden_units, input_dim), input_dim)
    b_in = u(keys[1], (n_hidden_units,), input_dim)
    w_h = u(keys[2], (n_hidden_layers, n_hidden_units, n_hidden_units),
            n_hidden_units)
    b_h = u(keys[3], (n_hidden_layers, n_hidden_units), n_hidden_units)
    w_out = u(keys[4], (output_dim, n_hidden_units), n_hidden_units)
    b_out = u(keys[5], (output_dim,), n_hidden_units)
    return w_in, b_in, w_h, b_h, w_out, b_out


def resmlp_reference(x, params, *, output_scale=1.0, activation="relu",
                     disable_residual_connections=False):
    """Pure-JAX reference mirroring the PyTorch forward."""
    act_fn = _ACTIVATIONS[activation]
    w_in, b_in, w_h, b_h, w_out, b_out = params
    out = act_fn(x @ w_in.T + b_in)
    for l in range(w_h.shape[0]):
        a = act_fn(out @ w_h[l].T + b_h[l])
        out = a if disable_residual_connections else out + a
    return output_scale * (out @ w_out.T + b_out)


if __name__ == "__main__":
    # TODO(synk): per-layer activation lists and SIREN init are not implemented
    # (single activation string + default init only).
    key = jax.random.PRNGKey(0)

    def check(batch, input_dim, output_dim, L, H, scale, disable_res,
              batch_tile):
        kx, kp = jax.random.split(jax.random.fold_in(key, 17 * batch + L))
        x = jax.random.normal(kx, (batch, input_dim), jnp.float32)
        params = init_params(kp, input_dim, output_dim, L, H)
        y = resmlp_forward(x, params, output_scale=scale,
                           disable_residual_connections=disable_res,
                           batch_tile=batch_tile)
        y = jax.block_until_ready(y)
        y_ref = resmlp_reference(x, params, output_scale=scale,
                                 disable_residual_connections=disable_res)
        assert y.shape == (batch, output_dim)
        assert jnp.allclose(y, y_ref, atol=1e-4, rtol=1e-4), \
            "mismatch vs reference"

    # Main config (relu, residual connections, output scale).
    check(batch=16, input_dim=4, output_dim=3, L=2, H=32, scale=2.0,
          disable_res=False, batch_tile=256)
    # Multi-tile grid with batch padding (N not a multiple of the tile).
    check(batch=40, input_dim=4, output_dim=3, L=2, H=32, scale=1.0,
          disable_res=True, batch_tile=16)
    # No hidden layers (exercises the zero-extent-block guard).
    check(batch=8, input_dim=4, output_dim=3, L=0, H=32, scale=1.0,
          disable_res=False, batch_tile=128)

    print("KERNEL_OK")
</pallas_src>

<mosaic_0001>
module attributes {stable_mosaic.version = 11 : i64} {
  func.func @_resmlp_kernel(%arg0: i32, %arg1: memref<16x128xf32, #tpu.memory_space<vmem>>, %arg2: memref<128x128xf32, #tpu.memory_space<vmem>>, %arg3: memref<1x128xf32, #tpu.memory_space<vmem>>, %arg4: memref<2x128x128xf32, #tpu.memory_space<vmem>>, %arg5: memref<2x1x128xf32, #tpu.memory_space<vmem>>, %arg6: memref<128x128xf32, #tpu.memory_space<vmem>>, %arg7: memref<1x128xf32, #tpu.memory_space<vmem>>, %arg8: memref<16x128xf32, #tpu.memory_space<vmem>>) attributes {dimension_semantics = [#tpu.dimension_semantics<parallel>], iteration_bounds = array<i64: 1>, scalar_prefetch = 0 : i64, scratch_operands = 0 : i64, tpu.core_type = #tpu.core_type<tc>, window_params = [{transform_indices = @transform_0, window_bounds = array<i64: 16, 128>}, {pipeline_mode = #tpu.pipeline_mode<synchronous>, transform_indices = @transform_1, window_bounds = array<i64: 128, 128>}, {pipeline_mode = #tpu.pipeline_mode<synchronous>, transform_indices = @transform_2, window_bounds = array<i64: 1, 128>}, {pipeline_mode = #tpu.pipeline_mode<synchronous>, transform_indices = @transform_3, window_bounds = array<i64: 2, 128, 128>}, {pipeline_mode = #tpu.pipeline_mode<synchronous>, transform_indices = @transform_4, window_bounds = array<i64: 2, 1, 128>}, {pipeline_mode = #tpu.pipeline_mode<synchronous>, transform_indices = @transform_5, window_bounds = array<i64: 128, 128>}, {pipeline_mode = #tpu.pipeline_mode<synchronous>, transform_indices = @transform_6, window_bounds = array<i64: 1, 128>}, {transform_indices = @transform_7, window_bounds = array<i64: 16, 128>}]} {
    %c0 = arith.constant 0 : index
    %c0_0 = arith.constant 0 : index
    %0 = vector.load %arg1[%c0, %c0_0] : memref<16x128xf32, #tpu.memory_space<vmem>>, vector<16x128xf32>
    %c0_1 = arith.constant 0 : index
    %c0_2 = arith.constant 0 : index
    %1 = vector.load %arg2[%c0_1, %c0_2] : memref<128x128xf32, #tpu.memory_space<vmem>>, vector<128x128xf32>
    %cst = arith.constant dense<0.000000e+00> : vector<16x128xf32>
    %2 = tpu.matmul %0, %1, %cst {dimension_numbers = #tpu.dot_dimension_numbers<[1], [0], [0], [1], [0, 0, 1, 1], [], []>} : vector<16x128xf32>, vector<128x128xf32>, vector<16x128xf32> -> vector<16x128xf32>
    %c0_3 = arith.constant 0 : index
    %c0_4 = arith.constant 0 : index
    %3 = vector.load %arg3[%c0_3, %c0_4] : memref<1x128xf32, #tpu.memory_space<vmem>>, vector<1x128xf32>
    %4 = vector.broadcast %3 : vector<1x128xf32> to vector<16x128xf32>
    %5 = arith.addf %2, %4 : vector<16x128xf32>
    %cst_5 = arith.constant 0.000000e+00 : f32
    %6 = vector.broadcast %cst_5 : f32 to vector<16x128xf32>
    %7 = arith.maximumf %5, %6 : vector<16x128xf32>
    %c0_6 = arith.constant 0 : index
    %c0_7 = arith.constant 0 : index
    %c0_8 = arith.constant 0 : index
    %8 = vector.load %arg4[%c0_6, %c0_7, %c0_8] : memref<2x128x128xf32, #tpu.memory_space<vmem>>, vector<1x128x128xf32>
    %9 = vector.shape_cast %8 : vector<1x128x128xf32> to vector<128x128xf32>
    %c0_9 = arith.constant 0 : index
    %c0_10 = arith.constant 0 : index
    %c0_11 = arith.constant 0 : index
    %10 = vector.load %arg5[%c0_9, %c0_10, %c0_11] : memref<2x1x128xf32, #tpu.memory_space<vmem>>, vector<1x1x128xf32>
    %11 = vector.shape_cast %10 : vector<1x1x128xf32> to vector<1x128xf32>
    %cst_12 = arith.constant dense<0.000000e+00> : vector<16x128xf32>
    %12 = tpu.matmul %7, %9, %cst_12 {dimension_numbers = #tpu.dot_dimension_numbers<[1], [0], [0], [1], [0, 0, 1, 1], [], []>} : vector<16x128xf32>, vector<128x128xf32>, vector<16x128xf32> -> vector<16x128xf32>
    %13 = vector.broadcast %11 : vector<1x128xf32> to vector<16x128xf32>
    %14 = arith.addf %12, %13 : vector<16x128xf32>
    %cst_13 = arith.constant 0.000000e+00 : f32
    %15 = vector.broadcast %cst_13 : f32 to vector<16x128xf32>
    %16 = arith.maximumf %14, %15 : vector<16x128xf32>
    %17 = arith.addf %7, %16 : vector<16x128xf32>
    %c1 = arith.constant 1 : index
    %c0_14 = arith.constant 0 : index
    %c0_15 = arith.constant 0 : index
    %18 = vector.load %arg4[%c1, %c0_14, %c0_15] : memref<2x128x128xf32, #tpu.memory_space<vmem>>, vector<1x128x128xf32>
    %19 = vector.shape_cast %18 : vector<1x128x128xf32> to vector<128x128xf32>
    %c1_16 = arith.constant 1 : index
    %c0_17 = arith.constant 0 : index
    %c0_18 = arith.constant 0 : index
    %20 = vector.load %arg5[%c1_16, %c0_17, %c0_18] : memref<2x1x128xf32, #tpu.memory_space<vmem>>, vector<1x1x128xf32>
    %21 = vector.shape_cast %20 : vector<1x1x128xf32> to vector<1x128xf32>
    %cst_19 = arith.constant dense<0.000000e+00> : vector<16x128xf32>
    %22 = tpu.matmul %17, %19, %cst_19 {dimension_numbers = #tpu.dot_dimension_numbers<[1], [0], [0], [1], [0, 0, 1, 1], [], []>} : vector<16x128xf32>, vector<128x128xf32>, vector<16x128xf32> -> vector<16x128xf32>
    %23 = vector.broadcast %21 : vector<1x128xf32> to vector<16x128xf32>
    %24 = arith.addf %22, %23 : vector<16x128xf32>
    %cst_20 = arith.constant 0.000000e+00 : f32
    %25 = vector.broadcast %cst_20 : f32 to vector<16x128xf32>
    %26 = arith.maximumf %24, %25 : vector<16x128xf32>
    %27 = arith.addf %17, %26 : vector<16x128xf32>
    %c0_21 = arith.constant 0 : index
    %c0_22 = arith.constant 0 : index
    %28 = vector.load %arg6[%c0_21, %c0_22] : memref<128x128xf32, #tpu.memory_space<vmem>>, vector<128x128xf32>
    %cst_23 = arith.constant dense<0.000000e+00> : vector<16x128xf32>
    %29 = tpu.matmul %27, %28, %cst_23 {dimension_numbers = #tpu.dot_dimension_numbers<[1], [0], [0], [1], [0, 0, 1, 1], [], []>} : vector<16x128xf32>, vector<128x128xf32>, vector<16x128xf32> -> vector<16x128xf32>
    %c0_24 = arith.constant 0 : index
    %c0_25 = arith.constant 0 : index
    %30 = vector.load %arg7[%c0_24, %c0_25] : memref<1x128xf32, #tpu.memory_space<vmem>>, vector<1x128xf32>
    %31 = vector.broadcast %30 : vector<1x128xf32> to vector<16x128xf32>
    %32 = arith.addf %29, %31 : vector<16x128xf32>
    %cst_26 = arith.constant 2.000000e+00 : f32
    %33 = vector.broadcast %cst_26 : f32 to vector<16x128xf32>
    %34 = arith.mulf %33, %32 : vector<16x128xf32>
    %c0_27 = arith.constant 0 : index
    %c0_28 = arith.constant 0 : index
    %35 = vector.load %arg8[%c0_27, %c0_28] : memref<16x128xf32, #tpu.memory_space<vmem>>, vector<16x128xf32>
    tpu.vector_store %arg8[%c0_27, %c0_28], %34 {strides = array<i32>} : memref<16x128xf32, #tpu.memory_space<vmem>>, vector<16x128xf32>,
    return
  }
  func.func @transform_0(%arg0: i32) -> (i32, i32) {
    %c0_i32 = arith.constant 0 : i32
    %c0_i32_0 = arith.constant 0 : i32
    return %arg0, %c0_i32 : i32, i32
  }
  func.func @transform_1(%arg0: i32) -> (i32, i32) {
    %c0_i32 = arith.constant 0 : i32
    %c0_i32_0 = arith.constant 0 : i32
    %c0_i32_1 = arith.constant 0 : i32
    return %c0_i32, %c0_i32_0 : i32, i32
  }
  func.func @transform_2(%arg0: i32) -> (i32, i32) {
    %c0_i32 = arith.constant 0 : i32
    %c0_i32_0 = arith.constant 0 : i32
    %c0_i32_1 = arith.constant 0 : i32
    return %c0_i32, %c0_i32_0 : i32, i32
  }
  func.func @transform_3(%arg0: i32) -> (i32, i32, i32) {
    %c0_i32 = arith.constant 0 : i32
    %c0_i32_0 = arith.constant 0 : i32
    %c0_i32_1 = arith.constant 0 : i32
    %c0_i32_2 = arith.constant 0 : i32
    return %c0_i32, %c0_i32_0, %c0_i32_1 : i32, i32, i32
  }
  func.func @transform_4(%arg0: i32) -> (i32, i32, i32) {
    %c0_i32 = arith.constant 0 : i32
    %c0_i32_0 = arith.constant 0 : i32
    %c0_i32_1 = arith.constant 0 : i32
    %c0_i32_2 = arith.constant 0 : i32
    return %c0_i32, %c0_i32_0, %c0_i32_1 : i32, i32, i32
  }
  func.func @transform_5(%arg0: i32) -> (i32, i32) {
    %c0_i32 = arith.constant 0 : i32
    %c0_i32_0 = arith.constant 0 : i32
    %c0_i32_1 = arith.constant 0 : i32
    return %c0_i32, %c0_i32_0 : i32, i32
  }
  func.func @transform_6(%arg0: i32) -> (i32, i32) {
    %c0_i32 = arith.constant 0 : i32
    %c0_i32_0 = arith.constant 0 : i32
    %c0_i32_1 = arith.constant 0 : i32
    return %c0_i32, %c0_i32_0 : i32, i32
  }
  func.func @transform_7(%arg0: i32) -> (i32, i32) {
    %c0_i32 = arith.constant 0 : i32
    %c0_i32_0 = arith.constant 0 : i32
    return %arg0, %c0_i32 : i32, i32
  }
}

</mosaic_0001>

<bundles_post_ra>
// kernel: tpu_custom_call.1
= control target key start
LH: loop header
LB: loop body
LE: loop exit
PB: predicated region body
PF: predicated region fallthrough
CT: control target
= control target key end

     0   :  { %12 = vsyncpa [#allocation3], 0  ;;  %s1129_s0 = inlined_call_operand.hbm [shape: f32[16,128], index: 0, kind: input, shape index: {}]   ;;  %s1130_s1 = inlined_call_operand.hbm [shape: f32[128,128], index: 1, kind: input, shape index: {}]   ;;  %s1131_s2 = inlined_call_operand.vmem [shape: f32[1,128], index: 2, kind: input, shape index: {}]   ;;  %s1132_s3 = inlined_call_operand.hbm [shape: f32[2,128,128], index: 3, kind: input, shape index: {}]   ;;  %s1133_s4 = inlined_call_operand.vmem [shape: f32[2,1,128], index: 4, kind: input, shape index: {}]   ;;  %s1134_s5 = inlined_call_operand.hbm [shape: f32[128,128], index: 5, kind: input, shape index: {}]   ;;  %s1135_s6 = inlined_call_operand.vmem [shape: f32[1,128], index: 6, kind: input, shape index: {}]   ;;  %s1136_s7 = inlined_call_operand.hbm [shape: f32[16,128], index: 7, kind: output, shape index: {}]  }
   0x1   :  { %13 = vsyncpa [#allocation6], 0 }
   0x2   :  { %14 = vsyncpa [#allocation9], 0 }
   0x3   :  { %15 = vsyncpa [#allocation4], 0  ;;  %s981_s24 = smov [#allocation5]   ;;  %s982_s26 = smov [#allocation2]  }
   0x4   :  { %s33_s25 = sshll.u32 %s981_s24, 4  ;;  %s21_s27 = sshll.u32 %s982_s26, 4  ;;  %s34_s25 = int_to_ptr.vmem [resolvable:$true] %s33_s25  ;;  %s1028_s27 = int_to_ptr.vmem [resolvable:$true] %s21_s27 }
   0x5   :  { %s863_s30 = scalar_lea.hbm %s1130_s1, 2048 }
   0x6   :  { %p864_p0 = scmp.ne.s32.totalorder %s1130_s1, %s863_s30  ;;  %p867_p1 = scmp.lt.u32.totalorder %s863_s30, %s1130_s1 }
   0x8   :  { %p869_p2 = pnand %p867_p1, %p864_p0 }
   0xa   :  { %872 = shalt.err (!%p869_p2)
}
   0xb   :  { %s873_s12 = scalar_lea.vmem %s34_s25, 2048  ;;  %p878_p4 = scmp.lt.s32.totalorder %s34_s25, %s34_s25 }
   0xc   :  { %p874_p3 = scmp.ne.s32.totalorder %s34_s25, %s873_s12  ;;  %p879_p5 = scmp.lt.s32.totalorder %s873_s12, %s873_s12 }
   0xe   :  { %p880_p6 = por %p879_p5, %p878_p4 }
  0x10   :  { %p881_p7 = pnand %p880_p6, %p874_p3 }
  0x12   :  { %884 = shalt.err (!%p881_p7)
}
  0x13   :  { %s983_s13 = smov 128   ;;  %s984_s14 = smov 8  }
  0x14   :  { %39 = dma.hbm_to_vmem [thread:$0]  %s1130_s1, 2048, %s34_s25, [#allocation6], %s983_s13, %s983_s13, %s984_s14  }
  0x15   :  { %s885_s19 = scalar_lea.hbm %s1129_s0, 256 }
  0x16   :  { %p886_p8 = scmp.ne.s32.totalorder %s1129_s0, %s885_s19  ;;  %p889_p9 = scmp.lt.u32.totalorder %s885_s19, %s1129_s0 }
  0x18   :  { %p891_p10 = pnand %p889_p9, %p886_p8 }
  0x1a   :  { %894 = shalt.err (!%p891_p10)
}
  0x1b   :  { %s895_s24 = scalar_lea.vmem %s1028_s27, 256  ;;  %p900_p12 = scmp.lt.s32.totalorder %s1028_s27, %s1028_s27 }
  0x1c   :  { %p896_p11 = scmp.ne.s32.totalorder %s1028_s27, %s895_s24  ;;  %p901_p13 = scmp.lt.s32.totalorder %s895_s24, %s895_s24 }
  0x1e   :  { %p902_p0 = por %p901_p13, %p900_p12 }
  0x20   :  { %p903_p1 = pnand %p902_p0, %p896_p11 }
  0x22   :  { %906 = shalt.err (!%p903_p1)
}
  0x23   :  { %27 = dma.hbm_to_vmem [thread:$0]  %s1129_s0, 256, %s1028_s27, [#allocation3], %s983_s13, %s983_s13, %s984_s14  }
  0x24   :  { %s985_s26 = smov [#allocation7]   ;;  %s986_s29 = smov [#allocation8]  }
  0x25   :  { %s47_s28 = sshll.u32 %s985_s26, 4  ;;  %s61_s30 = sshll.u32 %s986_s29, 4  ;;  %s48_s28 = int_to_ptr.vmem [resolvable:$true] %s47_s28  ;;  %s1065_s30 = int_to_ptr.vmem [resolvable:$true] %s61_s30 }
  0x26   :  { %s907_s10 = scalar_lea.hbm %s1132_s3, 4096 }
  0x27   :  { %p908_p2 = scmp.ne.s32.totalorder %s1132_s3, %s907_s10  ;;  %p911_p3 = scmp.lt.u32.totalorder %s907_s10, %s1132_s3 }
  0x29   :  { %p913_p4 = pnand %p911_p3, %p908_p2 }
  0x2b   :  { %916 = shalt.err (!%p913_p4)
}
  0x2c   :  { %s917_s0 = scalar_lea.vmem %s48_s28, 4096  ;;  %p922_p6 = scmp.lt.s32.totalorder %s48_s28, %s48_s28 }
  0x2d   :  { %p918_p5 = scmp.ne.s32.totalorder %s48_s28, %s917_s0  ;;  %p923_p7 = scmp.lt.s32.totalorder %s917_s0, %s917_s0 }
  0x2f   :  { %p924_p8 = por %p923_p7, %p922_p6 }
  0x31   :  { %p925_p9 = pnand %p924_p8, %p918_p5 }
  0x33   :  { %928 = shalt.err (!%p925_p9)
}
  0x34   :  { %53 = dma.hbm_to_vmem [thread:$0]  %s1132_s3, 4096, %s48_s28, [#allocation6], %s983_s13, %s983_s13, %s984_s14  }
  0x35   :  { %s929_s20 = scalar_lea.hbm %s1134_s5, 2048 }
  0x36   :  { %p930_p10 = scmp.ne.s32.totalorder %s1134_s5, %s929_s20  ;;  %p933_p11 = scmp.lt.u32.totalorder %s929_s20, %s1134_s5 }
  0x38   :  { %p935_p12 = pnand %p933_p11, %p930_p10 }
  0x3a   :  { %938 = shalt.err (!%p935_p12)
}
  0x3b   :  { %s939_s1 = scalar_lea.vmem %s1065_s30, 2048  ;;  %p944_p0 = scmp.lt.s32.totalorder %s1065_s30, %s1065_s30 }
  0x3c   :  { %p940_p13 = scmp.ne.s32.totalorder %s1065_s30, %s939_s1  ;;  %p945_p1 = scmp.lt.s32.totalorder %s939_s1, %s939_s1 }
  0x3e   :  { %p946_p2 = por %p945_p1, %p944_p0 }
  0x40   :  { %p947_p3 = pnand %p946_p2, %p940_p13 }
  0x42   :  { %950 = shalt.err (!%p947_p3)
}
  0x43   :  { %67 = dma.hbm_to_vmem [thread:$0]  %s1134_s5, 2048, %s1065_s30, [#allocation9], %s983_s13, %s983_s13, %s984_s14  }
  0x44   :  { %973 = dma.done.wait [#allocation3], 256  }
  0x45   :  { %974 = vsyncadd [#allocation3], 4294967040 }
  0x46   :  { %975 = dma.done.wait [#allocation6], 6144  }
  0x47   :  { %976 = vsyncadd [#allocation6], 4294961152 }
  0x48   :  { %977 = dma.done.wait [#allocation9], 2048  }
  0x49   :  { %978 = vsyncadd [#allocation9], 4294965248  ;;  %v84_v0 = vld [vmem:[#allocation5] sm:$0xff]  ;;  %v85_v1 = vld [vmem:[#allocation5 + $0x8] sm:$0xff]  ;;  %s987_s10 = smov [#allocation10]  }
  0x4a   :  { %v86_v2 = vld [vmem:[#allocation5 + $0x10] sm:$0xff]  ;;  %v728_v3 = vpack.c.bf16 %v85_v1, %v84_v0  ;;  %v87_v4 = vld [vmem:[#allocation5 + $0x18] sm:$0xff]  ;;  %v88_v6 = vld [vmem:[#allocation5 + $0x20] sm:$0xff]  ;;  %s497_s11 = sshll.u32 %s987_s10, 4  ;;  %s498_s11 = int_to_ptr.vmem [resolvable:$true] %s497_s11 }
  0x4b   :  { %v732_v5 = vpack.c.bf16 %v87_v4, %v86_v2  ;;  %v89_v7 = vld [vmem:[#allocation5 + $0x28] sm:$0xff]  ;;  %v90_v9 = vld [vmem:[#allocation5 + $0x30] sm:$0xff]  ;;  %v91_v10 = vld [vmem:[#allocation5 + $0x38] sm:$0xff]  ;;  %p956_p5 = scmp.lt.s32.totalorder %s498_s11, %s498_s11 }
  0x4c   :  { %729 = vmatprep.subr.bf16.mxu0 %v728_v3  ;;  %v736_v8 = vpack.c.bf16 %v89_v7, %v88_v6  ;;  %v82_v11 = vld [vmem:[#allocation2] sm:$0xff]  ;;  %v184_v12 = vld [vmem:[#allocation7] sm:$0xff]  ;;  %v185_v13 = vld [vmem:[#allocation7 + $0x8] sm:$0xff]  ;;  %v740_v20 = vpack.c.bf16 %v91_v10, %v90_v9 }
  0x4d   :  { %731 = vmatpush3.bf16.msra.mxu0 %v728_v3  ;;  %620 = vmatprep.mubr.f32.mxu0 %v82_v11  ;;  %v186_v14 = vld [vmem:[#allocation7 + $0x10] sm:$0xff]  ;;  %v760_v15 = vpack.c.bf16 %v185_v13, %v184_v12  ;;  %v187_v16 = vld [vmem:[#allocation7 + $0x18] sm:$0xff]  ;;  %v188_v18 = vld [vmem:[#allocation7 + $0x20] sm:$0xff] }
  0x4e   :  { %733 = vmatprep.subr.bf16.mxu0 %v732_v5  ;;  %v764_v17 = vpack.c.bf16 %v187_v16, %v186_v14  ;;  %v189_v19 = vld [vmem:[#allocation7 + $0x28] sm:$0xff]  ;;  %v92_v21 = vld [vmem:[#allocation5 + $0x40] sm:$0xff]  ;;  %v190_v24 = vld [vmem:[#allocation7 + $0x30] sm:$0xff] }
  0x4f   :  { %761 = vmatprep.subr.bf16.mxu1 %v760_v15  ;;  %v93_v22 = vld [vmem:[#allocation5 + $0x48] sm:$0xff]  ;;  %v768_v23 = vpack.c.bf16 %v189_v19, %v188_v18  ;;  %v191_v25 = vld [vmem:[#allocation7 + $0x38] sm:$0xff]  ;;  %v94_v27 = vld [vmem:[#allocation5 + $0x50] sm:$0xff] }
  0x50   :  { %763 = vmatpush3.bf16.msra.mxu1 %v760_v15  ;;  %v744_v26 = vpack.c.bf16 %v93_v22, %v92_v21  ;;  %v95_v28 = vld [vmem:[#allocation5 + $0x58] sm:$0xff]  ;;  %v772_v29 = vpack.c.bf16 %v191_v25, %v190_v24  ;;  %v192_v30 = vld [vmem:[#allocation7 + $0x40] sm:$0xff]  ;;  %v193_v31 = vld [vmem:[#allocation7 + $0x48] sm:$0xff] }
  0x51   :  { %735 = vmatpush3.bf16.msra.mxu0 %v732_v5  ;;  %765 = vmatprep.subr.bf16.mxu1 %v764_v17  ;;  %v748_v32 = vpack.c.bf16 %v95_v28, %v94_v27  ;;  %v96_v33 = vld [vmem:[#allocation5 + $0x60] sm:$0xff]  ;;  %v97_v34 = vld [vmem:[#allocation5 + $0x68] sm:$0xff]  ;;  %v776_v35 = vpack.c.bf16 %v193_v31, %v192_v30  ;;  %v194_v36 = vld [vmem:[#allocation7 + $0x50] sm:$0xff] }
  0x52   :  { %737 = vmatprep.subr.bf16.mxu0 %v736_v8  ;;  %v195_v37 = vld [vmem:[#allocation7 + $0x58] sm:$0xff]  ;;  %v752_v38 = vpack.c.bf16 %v97_v34, %v96_v33  ;;  %v98_v39 = vld [vmem:[#allocation5 + $0x70] sm:$0xff]  ;;  %v196_v42 = vld [vmem:[#allocation7 + $0x60] sm:$0xff] }
  0x53   :  { %v99_v40 = vld [vmem:[#allocation5 + $0x78] sm:$0xff]  ;;  %v780_v41 = vpack.c.bf16 %v195_v37, %v194_v36  ;;  %v197_v43 = vld [vmem:[#allocation7 + $0x68] sm:$0xff]  ;;  %v198_v47 = vld [vmem:[#allocation7 + $0x70] sm:$0xff] }
  0x54   :  { %767 = vmatpush3.bf16.msra.mxu1 %v764_v17  ;;  %v756_v44 = vpack.c.bf16 %v99_v40, %v98_v39  ;;  %v784_v45 = vpack.c.bf16 %v197_v43, %v196_v42  ;;  %v83_v46 = vld [vmem:[#allocation2 + $0x8] sm:$0xff]  ;;  %v287_v50 = vld [vmem:[#allocation7 + $0x80] sm:$0xff]  ;;  %v288_v51 = vld [vmem:[#allocation7 + $0x88] sm:$0xff] }
  0x55   :  { %739 = vmatpush3.bf16.msra.mxu0 %v736_v8  ;;  %769 = vmatprep.subr.bf16.mxu1 %v768_v23  ;;  %v199_v48 = vld [vmem:[#allocation7 + $0x78] sm:$0xff]  ;;  %v289_v52 = vld [vmem:[#allocation7 + $0x90] sm:$0xff]  ;;  %v792_v53 = vpack.c.bf16 %v288_v51, %v287_v50  ;;  %v291_v56 = vld [vmem:[#allocation7 + $0xa0] sm:$0xff] }
  0x56   :  { %741 = vmatprep.subr.bf16.mxu0 %v740_v20  ;;  %v788_v49 = vpack.c.bf16 %v199_v48, %v198_v47  ;;  %v290_v54 = vld [vmem:[#allocation7 + $0x98] sm:$0xff]  ;;  %v292_v57 = vld [vmem:[#allocation7 + $0xa8] sm:$0xff]  ;;  %v293_v59 = vld [vmem:[#allocation7 + $0xb0] sm:$0xff] }
  0x57   :  { %v796_v55 = vpack.c.bf16 %v290_v54, %v289_v52  ;;  %v800_v58 = vpack.c.bf16 %v292_v57, %v291_v56  ;;  %v294_v60 = vld [vmem:[#allocation7 + $0xb8] sm:$0xff]  ;;  %v295_v62 = vld [vmem:[#allocation7 + $0xc0] sm:$0xff]  ;;  %v296_v63 = vld [vmem:[#allocation7 + $0xc8] sm:$0xff] }
  0x58   :  { %771 = vmatpush3.bf16.msra.mxu1 %v768_v23  ;;  %v804_v61 = vpack.c.bf16 %v294_v60, %v293_v59  ;;  %v808_v0 = vpack.c.bf16 %v296_v63, %v295_v62  ;;  %v297_v1 = vld [vmem:[#allocation7 + $0xd0] sm:$0xff]  ;;  %v298_v2 = vld [vmem:[#allocation7 + $0xd8] sm:$0xff]  ;;  %v299_v11 = vld [vmem:[#allocation7 + $0xe0] sm:$0xff] }
  0x59   :  { %743 = vmatpush3.bf16.msra.mxu0 %v740_v20  ;;  %773 = vmatprep.subr.bf16.mxu1 %v772_v29  ;;  %v812_v3 = vpack.c.bf16 %v298_v2, %v297_v1  ;;  %v511_v4 = vld [vmem:[%s1131_s2] ss:$0 sm:$0xff]  ;;  %v300_v12 = vld [vmem:[#allocation7 + $0xe8] sm:$0xff]  ;;  %v302_v15 = vld [vmem:[#allocation7 + $0xf8] sm:$0xff] }
  0x5a   :  { %745 = vmatprep.subr.bf16.mxu0 %v744_v26  ;;  %v816_v13 = vpack.c.bf16 %v300_v12, %v299_v11  ;;  %v301_v14 = vld [vmem:[#allocation7 + $0xf0] sm:$0xff]  ;;  %v390_v17 = vld [vmem:[#allocation8] sm:$0xff]  ;;  %v391_v18 = vld [vmem:[#allocation8 + $0x8] sm:$0xff] }
  0x5b   :  { %v820_v16 = vpack.c.bf16 %v302_v15, %v301_v14  ;;  %v392_v19 = vld [vmem:[#allocation8 + $0x10] sm:$0xff]  ;;  %v824_v20 = vpack.c.bf16 %v391_v18, %v390_v17  ;;  %v393_v21 = vld [vmem:[#allocation8 + $0x18] sm:$0xff]  ;;  %v394_v23 = vld [vmem:[#allocation8 + $0x20] sm:$0xff] }
  0x5c   :  { %775 = vmatpush3.bf16.msra.mxu1 %v772_v29  ;;  %v828_v22 = vpack.c.bf16 %v393_v21, %v392_v19  ;;  %v395_v24 = vld [vmem:[#allocation8 + $0x28] sm:$0xff]  ;;  %v397_v27 = vld [vmem:[#allocation8 + $0x38] sm:$0xff]  ;;  %v398_v29 = vld [vmem:[#allocation8 + $0x40] sm:$0xff] }
  0x5d   :  { %747 = vmatpush3.bf16.msra.mxu0 %v744_v26  ;;  %777 = vmatprep.subr.bf16.mxu1 %v776_v35  ;;  %v832_v25 = vpack.c.bf16 %v395_v24, %v394_v23  ;;  %v396_v26 = vld [vmem:[#allocation8 + $0x30] sm:$0xff]  ;;  %v399_v30 = vld [vmem:[#allocation8 + $0x48] sm:$0xff]  ;;  %v401_v33 = vld [vmem:[#allocation8 + $0x58] sm:$0xff] }
  0x5e   :  { %749 = vmatprep.subr.bf16.mxu0 %v748_v32  ;;  %v836_v28 = vpack.c.bf16 %v397_v27, %v396_v26  ;;  %v840_v31 = vpack.c.bf16 %v399_v30, %v398_v29  ;;  %v404_v47 = vld [vmem:[#allocation8 + $0x70] sm:$0xff]  ;;  %v405_v48 = vld [vmem:[#allocation8 + $0x78] sm:$0xff] }
  0x5f   :  { %v514_v50 = vld [vmem:[%s1133_s4 + $0x1] ss:$0 sm:$0xff]  ;;  %v515_v59 = vld [vmem:[%s1135_s6] ss:$0 sm:$0xff] }
  0x60   :  { %779 = vmatpush3.bf16.msra.mxu1 %v776_v35  ;;  %v512_v35 = vld [vmem:[%s1133_s4] ss:$0 sm:$0xff]  ;;  %s951_s4 = scalar_lea.vmem %s498_s11, 256 }
  0x61   :  { %751 = vmatpush3.bf16.msra.mxu0 %v748_v32  ;;  %781 = vmatprep.subr.bf16.mxu1 %v780_v41  ;;  %v400_v32 = vld [vmem:[#allocation8 + $0x50] sm:$0xff]  ;;  %p952_p4 = scmp.ne.s32.totalorder %s498_s11, %s951_s4  ;;  %p957_p6 = scmp.lt.s32.totalorder %s951_s4, %s951_s4 }
  0x62   :  { %753 = vmatprep.subr.bf16.mxu0 %v752_v38  ;;  %v844_v34 = vpack.c.bf16 %v401_v33, %v400_v32 }
  0x63   :  { %p958_p7 = por %p957_p6, %p956_p5 }
  0x64   :  { %783 = vmatpush3.bf16.msra.mxu1 %v780_v41 }
  0x65   :  { %755 = vmatpush3.bf16.msra.mxu0 %v752_v38  ;;  %785 = vmatprep.subr.bf16.mxu1 %v784_v45  ;;  %p959_p8 = pnand %p958_p7, %p952_p4 }
  0x66   :  { %757 = vmatprep.subr.bf16.mxu0 %v756_v44 }
  0x68   :  { %787 = vmatpush3.bf16.msra.mxu1 %v784_v45  ;;  %v403_v45 = vld [vmem:[#allocation8 + $0x68] sm:$0xff] }
  0x69   :  { %759 = vmatpush3.bf16.msra.mxu0 %v756_v44  ;;  %789 = vmatprep.subr.bf16.mxu1 %v788_v49  ;;  %v402_v44 = vld [vmem:[#allocation8 + $0x60] sm:$0xff] }
  0x6a   :  { %793 = vmatprep.subr.bf16.mxu0 %v792_v53 }
  0x6c   :  { %621 = vmatmul.mubr.f32.vlgmr.msra.gmra.mrb[0].mxu0 %v83_v46  ;;  %791 = vmatpush3.bf16.msra.mxu1 %v788_v49  ;;  %v848_v46 = vpack.c.bf16 %v403_v45, %v402_v44  ;;  %v852_v49 = vpack.c.bf16 %v405_v48, %v404_v47 }
  0x6d   :  { %795 = vmatpush3.bf16.msra.mxu0 %v792_v53  ;;  %825 = vmatprep.subr.bf16.mxu1 %v824_v20 }
  0x6e   :  { %797 = vmatprep.subr.bf16.mxu0 %v796_v55 }
  0x71   :  { %799 = vmatpush3.bf16.msra.mxu0 %v796_v55 }
  0x72   :  { %801 = vmatprep.subr.bf16.mxu0 %v800_v58 }
  0x75   :  { %803 = vmatpush3.bf16.msra.mxu0 %v800_v58 }
  0x76   :  { %805 = vmatprep.subr.bf16.mxu0 %v804_v61 }
  0x79   :  { %807 = vmatpush3.bf16.msra.mxu0 %v804_v61 }
  0x7a   :  { %809 = vmatprep.subr.bf16.mxu0 %v808_v0 }
  0x7d   :  { %811 = vmatpush3.bf16.msra.mxu0 %v808_v0 }
  0x7e   :  { %813 = vmatprep.subr.bf16.mxu0 %v812_v3 }
  0x81   :  { %815 = vmatpush3.bf16.msra.mxu0 %v812_v3 }
  0x82   :  { %817 = vmatprep.subr.bf16.mxu0 %v816_v13 }
  0x85   :  { %819 = vmatpush3.bf16.msra.mxu0 %v816_v13 }
  0x86   :  { %821 = vmatprep.subr.bf16.mxu0 %v820_v16 }
  0x89   :  { %823 = vmatpush3.bf16.msra.mxu0 %v820_v16 }
 0x13f   :  { %v622_v5 = vpop.f32.mrb[0].mxu0 }
 0x140   :  { %v179_v6 = vadd.f32 %v622_v5, %v511_v4  ;;  %v173_v7 = vpop.f32.mrb[1].mxu0 }
 0x141   :  { %v174_v8 = vadd.f32 %v511_v4, %v173_v7 }
 0x142   :  { %v183_v10 = vmax.f32 %v179_v6, 0.0 }
 0x143   :  { %v182_v9 = vmax.f32 %v174_v8, 0.0 }
 0x145   :  { %655 = vmatprep.mubr.f32.mxu1 %v182_v9 }
 0x146   :  { %656 = vmatmul.mubr.f32.vlgmr.msra.gmra.mrb[0].mxu1 %v183_v10 }
 0x147   :  { %827 = vmatpush3.bf16.msra.mxu1 %v824_v20 }
 0x148   :  { %829 = vmatprep.subr.bf16.mxu1 %v828_v22 }
 0x14b   :  { %831 = vmatpush3.bf16.msra.mxu1 %v828_v22 }
 0x14c   :  { %833 = vmatprep.subr.bf16.mxu1 %v832_v25 }
 0x14f   :  { %835 = vmatpush3.bf16.msra.mxu1 %v832_v25 }
 0x150   :  { %837 = vmatprep.subr.bf16.mxu1 %v836_v28 }
 0x153   :  { %839 = vmatpush3.bf16.msra.mxu1 %v836_v28 }
 0x154   :  { %841 = vmatprep.subr.bf16.mxu1 %v840_v31 }
 0x157   :  { %843 = vmatpush3.bf16.msra.mxu1 %v840_v31 }
 0x158   :  { %845 = vmatprep.subr.bf16.mxu1 %v844_v34 }
 0x15b   :  { %847 = vmatpush3.bf16.msra.mxu1 %v844_v34 }
 0x15c   :  { %849 = vmatprep.subr.bf16.mxu1 %v848_v46 }
 0x15f   :  { %851 = vmatpush3.bf16.msra.mxu1 %v848_v46 }
 0x160   :  { %853 = vmatprep.subr.bf16.mxu1 %v852_v49 }
 0x163   :  { %855 = vmatpush3.bf16.msra.mxu1 %v852_v49 }
 0x219   :  { %v657_v36 = vpop.f32.mrb[0].mxu1 }
 0x21a   :  { %v279_v37 = vadd.f32 %v657_v36, %v512_v35  ;;  %v273_v38 = vpop.f32.mrb[1].mxu1 }
 0x21b   :  { %v274_v39 = vadd.f32 %v512_v35, %v273_v38 }
 0x21c   :  { %v283_v40 = vmax.f32 %v279_v37, 0.0 }
 0x21d   :  { %v282_v41 = vmax.f32 %v274_v39, 0.0 }
 0x21e   :  { %v285_v43 = vadd.f32 %v283_v40, %v183_v10 }
 0x21f   :  { %v284_v42 = vadd.f32 %v282_v41, %v182_v9 }
 0x221   :  { %690 = vmatprep.mubr.f32.mxu0 %v284_v42 }
 0x222   :  { %691 = vmatmul.mubr.f32.vlgmr.msra.gmra.mrb[2].mxu0 %v285_v43 }
 0x2f5   :  { %v692_v51 = vpop.f32.mrb[2].mxu0 }
 0x2f6   :  { %v383_v52 = vadd.f32 %v692_v51, %v514_v50  ;;  %v377_v53 = vpop.f32.mrb[3].mxu0 }
 0x2f7   :  { %v378_v54 = vadd.f32 %v514_v50, %v377_v53 }
 0x2f8   :  { %v387_v55 = vmax.f32 %v383_v52, 0.0 }
 0x2f9   :  { %v386_v56 = vmax.f32 %v378_v54, 0.0 }
 0x2fa   :  { %v389_v58 = vadd.f32 %v387_v55, %v285_v43 }
 0x2fb   :  { %v388_v57 = vadd.f32 %v386_v56, %v284_v42 }
 0x2fd   :  { %725 = vmatprep.mubr.f32.mxu1 %v388_v57 }
 0x2fe   :  { %726 = vmatmul.mubr.f32.vlgmr.msra.gmra.mrb[2].mxu1 %v389_v58 }
 0x3d1   :  { %v727_v60 = vpop.f32.mrb[2].mxu1 }
 0x3d2   :  { %v485_v61 = vadd.f32 %v727_v60, %v515_v59  ;;  %v479_v62 = vpop.f32.mrb[3].mxu1 }
 0x3d3   :  { %v480_v63 = vadd.f32 %v515_v59, %v479_v62 }
 0x3d4   :  { %v489_v0 = vmul.f32 2.0, %v485_v61 }
 0x3d5   :  { %v488_v1 = vmul.f32 2.0, %v480_v63 }
 0x3d6   :  { %491 = vst [vmem:[#allocation10 + $0x8] sm:$0xff] %v489_v0 }
 0x3d7   :  { %490 = vst [vmem:[#allocation10] sm:$0xff] %v488_v1 }
 0x3d8   :  { %962 = shalt.err (!%p959_p8)
}
 0x3d9   :  { %s963_s15 = scalar_lea.hbm %s1136_s7, 256 }
 0x3da   :  { %p964_p9 = scmp.ne.s32.totalorder %s1136_s7, %s963_s15  ;;  %p967_p10 = scmp.lt.u32.totalorder %s963_s15, %s1136_s7 }
 0x3dc   :  { %p969_p11 = pnand %p967_p10, %p964_p9 }
 0x3de   :  { %972 = shalt.err (!%p969_p11)
}
 0x3df   :  { %503 = dma.vmem_to_hbm [thread:$0]  %s498_s11, 256, %s1136_s7, [#allocation4], %s983_s13, %s983_s13, %s984_s14  }
 0x3e0   :  { %979 = dma.done.wait [#allocation4], 256  }
 0x3e1   :  { %980 = vsyncadd [#allocation4], 4294967040 }
 0x3e2   :  { %507 = vsyncpa [#allocation3], 1 }
 0x3e3   :  { %508 = vsyncpa [#allocation6], 1 }
 0x3e4   :  { %509 = vsyncpa [#allocation9], 1 }
 0x3e5   :  { %510 = vsyncpa [#allocation4], 1 }

</bundles_post_ra>
